<compile_context>
chip_gen: v7x
topology: tpu7x:2x2x1
jax: 0.10.0
libtpu: 0.0.40
codegen_flags: <defaults>
</compile_context>

<pallas_src>
import math
from functools import partial

import jax
import jax.numpy as jnp
from jax.experimental import pallas as pl
from jax.experimental.pallas import tpu as pltpu

VMEM_LIMIT = 64 * 1024 * 1024  # sized for v7x (64 MiB); also fine on v5e/v6e


def _pick_tile(n, target, quantum):
    """Largest tile <= target that divides n and is a multiple of quantum.
    Falls back to the full dimension (always a legal single block)."""
    if n <= target:
        return n
    t = (target // quantum) * quantum
    while t >= quantum:
        if n % t == 0:
            return t
        t -= quantum
    return n


# --------------------------- plain tiled matmul -----------------------------

def _matmul_kernel(x_ref, w_ref, o_ref):
    o_ref[...] = jnp.dot(x_ref[...], w_ref[...],
                         preferred_element_type=jnp.float32).astype(o_ref.dtype)


def pallas_matmul(x, w, out_dtype=jnp.bfloat16):
    n, k = x.shape
    k2, m = w.shape
    assert k == k2
    tm = _pick_tile(n, 256, 8)
    tc = _pick_tile(m, 512, 128)
    return pl.pallas_call(
        _matmul_kernel,
        grid=(n // tm, m // tc),
        in_specs=[pl.BlockSpec((tm, k), lambda i, j: (i, 0)),
                  pl.BlockSpec((k, tc), lambda i, j: (0, j))],
        out_specs=pl.BlockSpec((tm, tc), lambda i, j: (i, j)),
        out_shape=jax.ShapeDtypeStruct((n, m), out_dtype),
        compiler_params=pltpu.CompilerParams(
            dimension_semantics=("parallel", "parallel"),
            vmem_limit_bytes=VMEM_LIMIT),
    )(x, w)


# ---------------------- fused RMSNorm + matmul (QKV) ------------------------

def _rmsnorm_matmul_kernel(x_ref, nw_ref, w_ref, o_ref, xn_ref, *, eps):
    # normalize once per row tile (column axis is sequential / "arbitrary")
    @pl.when(pl.program_id(1) == 0)
    def _():
        x = x_ref[...].astype(jnp.float32)
        ms = jnp.mean(x * x, axis=-1, keepdims=True)
        xn_ref[...] = (x * jax.lax.rsqrt(ms + eps) * nw_ref[...]).astype(xn_ref.dtype)
    o_ref[...] = jnp.dot(xn_ref[...], w_ref[...],
                         preferred_element_type=jnp.float32).astype(o_ref.dtype)


def pallas_rmsnorm_matmul(x, norm_w, w, eps, out_dtype=jnp.bfloat16):
    n, d = x.shape
    d2, m = w.shape
    assert d == d2
    tm = _pick_tile(n, 256, 8)
    tc = _pick_tile(m, 512, 128)
    return pl.pallas_call(
        partial(_rmsnorm_matmul_kernel, eps=eps),
        grid=(n // tm, m // tc),
        in_specs=[pl.BlockSpec((tm, d), lambda i, j: (i, 0)),
                  pl.BlockSpec((1, d), lambda i, j: (0, 0)),
                  pl.BlockSpec((d, tc), lambda i, j: (0, j))],
        out_specs=pl.BlockSpec((tm, tc), lambda i, j: (i, j)),
        out_shape=jax.ShapeDtypeStruct((n, m), out_dtype),
        scratch_shapes=[pltpu.VMEM((tm, d), jnp.bfloat16)],
        compiler_params=pltpu.CompilerParams(
            dimension_semantics=("parallel", "arbitrary"),
            vmem_limit_bytes=VMEM_LIMIT),
    )(x, norm_w.astype(jnp.float32), w)


# ---------------------- matmul + residual add (wo proj) ---------------------

def _matmul_resid_kernel(a_ref, w_ref, r_ref, o_ref):
    o_ref[...] = (jnp.dot(a_ref[...], w_ref[...], preferred_element_type=jnp.float32)
                  + r_ref[...].astype(jnp.float32)).astype(o_ref.dtype)


def pallas_matmul_resid(a, w, resid):
    n, k = a.shape
    _, m = w.shape
    tm = _pick_tile(n, 256, 8)
    tc = _pick_tile(m, 512, 128)
    return pl.pallas_call(
        _matmul_resid_kernel,
        grid=(n // tm, m // tc),
        in_specs=[pl.BlockSpec((tm, k), lambda i, j: (i, 0)),
                  pl.BlockSpec((k, tc), lambda i, j: (0, j)),
                  pl.BlockSpec((tm, tc), lambda i, j: (i, j))],
        out_specs=pl.BlockSpec((tm, tc), lambda i, j: (i, j)),
        out_shape=jax.ShapeDtypeStruct((n, m), jnp.float32),
        compiler_params=pltpu.CompilerParams(
            dimension_semantics=("parallel", "parallel"),
            vmem_limit_bytes=VMEM_LIMIT),
    )(a, w, resid)


# ---------------- fused RMSNorm + SwiGLU FFN + residual add -----------------

def _ffn_kernel(h_ref, nw_ref, w1_ref, w3_ref, w2_ref, o_ref, xn_ref, acc_ref, *, eps):
    j = pl.program_id(1)

    @pl.when(j == 0)
    def _():
        x = h_ref[...].astype(jnp.float32)
        ms = jnp.mean(x * x, axis=-1, keepdims=True)
        xn_ref[...] = (x * jax.lax.rsqrt(ms + eps) * nw_ref[...]).astype(xn_ref.dtype)
        acc_ref[...] = jnp.zeros(acc_ref.shape, acc_ref.dtype)

    xn = xn_ref[...]
    h1 = jnp.dot(xn, w1_ref[...], preferred_element_type=jnp.float32)
    h3 = jnp.dot(xn, w3_ref[...], preferred_element_type=jnp.float32)
    g = (h1 * jax.nn.sigmoid(h1)) * h3            # SiLU(w1 x) * (w3 x) in f32
    acc_ref[...] += jnp.dot(g.astype(w2_ref.dtype), w2_ref[...],
                            preferred_element_type=jnp.float32)

    @pl.when(j == pl.num_programs(1) - 1)
    def _():
        o_ref[...] = h_ref[...].astype(jnp.float32) + acc_ref[...]


def pallas_ffn(h2d, norm_w, w1, w3, w2, eps):
    n, d = h2d.shape
    hid = w1.shape[1]
    tm = _pick_tile(n, 256, 8)
    th = _pick_tile(hid, 512, 128)
    return pl.pallas_call(
        partial(_ffn_kernel, eps=eps),
        grid=(n // tm, hid // th),
        in_specs=[pl.BlockSpec((tm, d), lambda i, j: (i, 0)),
                  pl.BlockSpec((1, d), lambda i, j: (0, 0)),
                  pl.BlockSpec((d, th), lambda i, j: (0, j)),
                  pl.BlockSpec((d, th), lambda i, j: (0, j)),
                  pl.BlockSpec((th, d), lambda i, j: (j, 0))],
        out_specs=pl.BlockSpec((tm, d), lambda i, j: (i, 0)),
        out_shape=jax.ShapeDtypeStruct((n, d), jnp.float32),
        scratch_shapes=[pltpu.VMEM((tm, d), jnp.bfloat16),
                        pltpu.VMEM((tm, d), jnp.float32)],
        compiler_params=pltpu.CompilerParams(
            dimension_semantics=("parallel", "arbitrary"),
            vmem_limit_bytes=VMEM_LIMIT),
    )(h2d, norm_w.astype(jnp.float32), w1, w3, w2)


# ------------------ adapter-prefix attention (per batch) --------------------

def _attn_kernel(q_ref, k_ref, v_ref, ak_ref, av_ref, mask_ref, o_ref,
                 *, n_heads, head_dim, scale):
    q = q_ref[0]            # (tq, H*Dh) bf16
    k = k_ref[0]            # (S,  H*Dh) bf16
    v = v_ref[0]            # (S,  H*Dh) bf16
    ak = ak_ref[...]        # (La, H*Dh) bf16  (shared across batch)
    av = av_ref[...]        # (La, H*Dh) bf16  (pre-scaled by tanh(gate) per head)
    mask = mask_ref[...]    # (tq, S) f32 causal mask
    outs = []
    for h in range(n_heads):                      # static unroll over heads
        lo = h * head_dim
        hi = lo + head_dim
        qh, kh, vh = q[:, lo:hi], k[:, lo:hi], v[:, lo:hi]
        akh, avh = ak[:, lo:hi], av[:, lo:hi]
        s_vt = jax.lax.dot_general(qh, kh, (((1,), (1,)), ((), ())),
                                   preferred_element_type=jnp.float32) * scale + mask
        s_ad = jax.lax.dot_general(qh, akh, (((1,), (1,)), ((), ())),
                                   preferred_element_type=jnp.float32) * scale
        # two segment softmaxes (torch semantics): one exp per score element,
        # EUP-approx reciprocals for the denominators.
        e_vt = jnp.exp(s_vt - jnp.max(s_vt, axis=-1, keepdims=True))
        p_vt = e_vt * pl.reciprocal(jnp.sum(e_vt, axis=-1, keepdims=True), approx=True)
        e_ad = jnp.exp(s_ad - jnp.max(s_ad, axis=-1, keepdims=True))
        p_ad = e_ad * pl.reciprocal(jnp.sum(e_ad, axis=-1, keepdims=True), approx=True)
        oh = jnp.dot(p_vt.astype(vh.dtype), vh, preferred_element_type=jnp.float32)
        oh = oh + jnp.dot(p_ad.astype(avh.dtype), avh, preferred_element_type=jnp.float32)
        outs.append(oh)
    # single lane-dense store in [S, H*Dh] layout (no head transpose in HBM)
    o_ref[0] = jnp.concatenate(outs, axis=-1).astype(o_ref.dtype)


def pallas_attention(q, k, v, ak, av_gated, mask, n_heads, head_dim):
    """q,k,v:[B,S,H*Dh] (bf16), ak/av:[La,H*Dh] shared, mask:[S,S] -> [B,S,H*Dh]."""
    B, S, D = q.shape
    La = ak.shape[0]
    tq = _pick_tile(S, 128, 8)
    scale = 1.0 / math.sqrt(head_dim)
    return pl.pallas_call(
        partial(_attn_kernel, n_heads=n_heads, head_dim=head_dim, scale=scale),
        grid=(B, S // tq),
        in_specs=[pl.BlockSpec((1, tq, D), lambda b, qi: (b, qi, 0)),
                  pl.BlockSpec((1, S, D), lambda b, qi: (b, 0, 0)),
                  pl.BlockSpec((1, S, D), lambda b, qi: (b, 0, 0)),
                  pl.BlockSpec((La, D), lambda b, qi: (0, 0)),
                  pl.BlockSpec((La, D), lambda b, qi: (0, 0)),
                  pl.BlockSpec((tq, S), lambda b, qi: (qi, 0))],
        out_specs=pl.BlockSpec((1, tq, D), lambda b, qi: (b, qi, 0)),
        out_shape=jax.ShapeDtypeStruct((B, S, D), jnp.bfloat16),
        compiler_params=pltpu.CompilerParams(
            dimension_semantics=("parallel", "parallel"),
            vmem_limit_bytes=VMEM_LIMIT),
    )(q, k, v, ak, av_gated, mask)


# ------- fused final RMSNorm + output projection + cross entropy ------------

def _norm_logits_ce_kernel(h_ref, nw_ref, w_ref, lab_ref, nll_ref, cnt_ref,
                           xn_ref, m_ref, s_ref, p_ref, *, eps, tv):
    j = pl.program_id(1)

    @pl.when(j == 0)
    def _():
        x = h_ref[...].astype(jnp.float32)
        ms = jnp.mean(x * x, axis=-1, keepdims=True)
        xn_ref[...] = (x * jax.lax.rsqrt(ms + eps) * nw_ref[...]).astype(xn_ref.dtype)
        m_ref[...] = jnp.full(m_ref.shape, -jnp.inf, m_ref.dtype)
        s_ref[...] = jnp.zeros(s_ref.shape, s_ref.dtype)
        p_ref[...] = jnp.zeros(p_ref.shape, p_ref.dtype)

    logits = jnp.dot(xn_ref[...], w_ref[...], preferred_element_type=jnp.float32)
    lab = lab_ref[...]                                        # (tm, 1) int32
    col = jax.lax.broadcasted_iota(jnp.int32, logits.shape, 1) + j * tv
    p_ref[...] += jnp.sum(jnp.where(col == lab, logits, 0.0),
                          axis=-1, keepdims=True)
    # online logsumexp over the vocab reduction axis (logits never hit HBM)
    m_new = jnp.maximum(m_ref[...], jnp.max(logits, axis=-1, keepdims=True))
    s_ref[...] = (s_ref[...] * jnp.exp(m_ref[...] - m_new)
                  + jnp.sum(jnp.exp(logits - m_new), axis=-1, keepdims=True))
    m_ref[...] = m_new

    @pl.when(j == pl.num_programs(1) - 1)
    def _():
        valid = (lab != 0).astype(jnp.float32)                # ignore_index = 0
        nll_ref[...] = (m_ref[...] + jnp.log(s_ref[...]) - p_ref[...]) * valid
        cnt_ref[...] = valid


def pallas_norm_logits_ce(h2d, norm_w, w_out, labels, eps):
    n, d = h2d.shape
    v = w_out.shape[1]
    tm = _pick_tile(n, 256, 8)
    tv = _pick_tile(v, 1024, 128)
    nll, cnt = pl.pallas_call(
        partial(_norm_logits_ce_kernel, eps=eps, tv=tv),
        grid=(n // tm, v // tv),
        in_specs=[pl.BlockSpec((tm, d), lambda i, j: (i, 0)),
                  pl.BlockSpec((1, d), lambda i, j: (0, 0)),
                  pl.BlockSpec((d, tv), lambda i, j: (0, j)),
                  pl.BlockSpec((tm, 1), lambda i, j: (i, 0))],
        out_specs=(pl.BlockSpec((tm, 1), lambda i, j: (i, 0)),
                   pl.BlockSpec((tm, 1), lambda i, j: (i, 0))),
        out_shape=(jax.ShapeDtypeStruct((n, 1), jnp.float32),
                   jax.ShapeDtypeStruct((n, 1), jnp.float32)),
        scratch_shapes=[pltpu.VMEM((tm, d), jnp.bfloat16),
                        pltpu.VMEM((tm, 1), jnp.float32),
                        pltpu.VMEM((tm, 1), jnp.float32),
                        pltpu.VMEM((tm, 1), jnp.float32)],
        compiler_params=pltpu.CompilerParams(
            dimension_semantics=("parallel", "arbitrary"),
            vmem_limit_bytes=VMEM_LIMIT),
    )(h2d, norm_w.astype(jnp.float32), w_out, labels)
    return nll, cnt


# ------------------------------ JAX glue -----------------------------------

def precompute_rope_full(head_dim, n_heads, end, theta=10000.0):
    """Interleaved cos/sin tables expanded to full width H*Dh (pairs per head)."""
    freqs = 1.0 / (theta ** (jnp.arange(0, head_dim, 2)[: head_dim // 2]
                             .astype(jnp.float32) / head_dim))
    t = jnp.arange(end, dtype=jnp.float32)
    angles = jnp.outer(t, freqs)                      # (end, Dh/2)
    cos = jnp.repeat(jnp.cos(angles), 2, axis=-1)     # (end, Dh) interleaved
    sin = jnp.repeat(jnp.sin(angles), 2, axis=-1)
    return jnp.tile(cos, (1, n_heads)), jnp.tile(sin, (1, n_heads))


def apply_rope(x, cos_f, sin_f):
    """Interleaved (complex-pair) RoPE on x:[B,S,H*Dh] in f32 (torch convention).
    # TODO(synk): could be fused into the QKV kernel epilogue; kept as a small XLA op."""
    B, S, D = x.shape
    xf = x.astype(jnp.float32)
    xr = xf.reshape(B, S, D // 2, 2)
    x_swap = jnp.stack([-xr[..., 1], xr[..., 0]], axis=-1).reshape(B, S, D)
    return xf * cos_f[None] + x_swap * sin_f[None]


def transformer_forward(params, cfg, data, inference=False):
    # TODO(synk): only the main training branch is implemented
    # (edl_mse / vaq / aqa / inference branches of the torch forward are off).
    loss = {}
    D, H, Dh = cfg['dim'], cfg['n_heads'], cfg['head_dim']
    La, eps = cfg['adapter_len'], cfg['norm_eps']
    bf = jnp.bfloat16

    adapter = params['adapter_query'].reshape(-1, La, D)      # (adapter_layer, La, D)

    vqa_id = data['text_id']['vqa']
    vqa_label = data['label']['vqa']
    vqa_video_start = data['video_start']['vqa'][0]
    bsz, n_options, seqlen = vqa_id.shape

    # ---- pre-cast / pre-fuse weights once (bf16 MXU inputs) ----
    layers = []
    for lw in params['layers'][-cfg['adapter_layer']:]:
        layers.append(dict(
            wqkv=jnp.concatenate([lw['wq'], lw['wk'], lw['wv']], axis=1).astype(bf),
            wkv=jnp.concatenate([lw['wk'], lw['wv']], axis=1).astype(bf),
            wo=lw['wo'].astype(bf),
            w1=lw['w1'].astype(bf), w3=lw['w3'].astype(bf), w2=lw['w2'].astype(bf),
            attention_norm=lw['attention_norm'].reshape(1, D),
            ffn_norm=lw['ffn_norm'].reshape(1, D),
            gate_tanh=jnp.tanh(lw['gate']),                   # tanh hoisted out of kernel
        ))
    w_out = params['output'].astype(bf)
    norm_w = params['norm'].reshape(1, D)

    # ---- video features (torch does .half(); emulate with TPU-native bf16) ----
    video = data['video']
    vf = pallas_matmul(video.reshape(-1, video.shape[-1]).astype(bf),
                       params['visual_proj'].astype(bf),
                       out_dtype=jnp.float32).reshape(bsz, cfg['max_feats'], D)
    video_feature = (vf + params['temporal_emb'][None]).astype(bf)

    vqa_id2 = vqa_id.reshape(-1, seqlen)
    labels = vqa_label.reshape(-1, seqlen)[:, 1:].reshape(-1, 1).astype(jnp.int32)

    h = jnp.take(params['tok_embeddings'], vqa_id2, axis=0)   # embedding gather (XLA)
    h = h.at[:, vqa_video_start:vqa_video_start + cfg['max_feats']
             ].set(video_feature.astype(h.dtype))

    cos_f = cfg['rope_cos'][:seqlen]
    sin_f = cfg['rope_sin'][:seqlen]
    mask = jnp.triu(jnp.full((seqlen, seqlen), -jnp.inf, jnp.float32), k=1)

    B = h.shape[0]
    for i, lw in enumerate(layers):
        # adapter K/V: computed once per layer, shared across the batch; the
        # per-head tanh(gate) is folded into the adapter values.
        ad = adapter[i].astype(bf)                            # emulates adapter[i].half()
        akv = pallas_matmul(ad, lw['wkv'])                    # (La, 2D) bf16
        ak = akv[:, :D]
        av_g = (akv[:, D:].reshape(La, H, Dh)
                * lw['gate_tanh'][None, :, None]).reshape(La, D).astype(bf)

        # ---- attention sub-block: fused RMSNorm + QKV, RoPE, attention, wo+residual
        qkv = pallas_rmsnorm_matmul(h.reshape(-1, D), lw['attention_norm'],
                                    lw['wqkv'], eps).reshape(B, seqlen, 3 * D)
        xq = apply_rope(qkv[..., :D], cos_f, sin_f).astype(bf)
        xk = apply_rope(qkv[..., D:2 * D], cos_f, sin_f).astype(bf)
        xv = qkv[..., 2 * D:]
        attn = pallas_attention(xq, xk, xv, ak, av_g, mask, H, Dh)   # (B,S,D) bf16
        h = pallas_matmul_resid(attn.reshape(-1, D), lw['wo'],
                                h.reshape(-1, D)).reshape(B, seqlen, D)

        # ---- FFN sub-block: fused RMSNorm + SwiGLU + w2 + residual
        h = pallas_ffn(h.reshape(-1, D), lw['ffn_norm'], lw['w1'], lw['w3'],
                       lw['w2'], eps).reshape(B, seqlen, D)

    # ---- fused final RMSNorm + output projection + CE (ignore_index=0);
    # note logits[:, :-1] == output(norm(h[:, :-1])) since both are row-wise.
    h_ce = h[:, :-1, :].reshape(-1, D)
    nll, cnt = pallas_norm_logits_ce(h_ce, norm_w, w_out, labels, eps)
    loss['vqa'] = jnp.sum(nll) / jnp.sum(cnt)
    return loss


# ----------------------------- init & driver -------------------------------

def init_params(key, cfg):
    keys = iter(jax.random.split(key, 8 + 12 * cfg['n_layers']))

    def nrm(shape, scale=0.02):
        return scale * jax.random.normal(next(keys), shape, jnp.float32)

    dim, hidden = cfg['dim'], cfg['hidden_dim']
    params = {
        'tok_embeddings': nrm((cfg['vocab_size'], dim)),
        'adapter_query': nrm((cfg['adapter_len'] * cfg['adapter_layer'], dim)),
        'visual_proj': nrm((768, dim)),
        'temporal_emb': nrm((cfg['max_feats'], dim)),
        'norm': jnp.ones((dim,), jnp.float32) + nrm((dim,), 0.05),
        'output': nrm((dim, cfg['vocab_size'])),
        'layers': [],
    }
    for _ in range(cfg['n_layers']):
        params['layers'].append({
            'wq': nrm((dim, dim)), 'wk': nrm((dim, dim)),
            'wv': nrm((dim, dim)), 'wo': nrm((dim, dim)),
            'gate': nrm((cfg['n_heads'],), 0.5),   # torch inits zeros; random to exercise gate
            'attention_norm': jnp.ones((dim,), jnp.float32) + nrm((dim,), 0.05),
            'ffn_norm': jnp.ones((dim,), jnp.float32) + nrm((dim,), 0.05),
            'w1': nrm((dim, hidden)), 'w3': nrm((dim, hidden)),
            'w2': nrm((hidden, dim)),
        })
    return params


if __name__ == "__main__":
    cfg = dict(dim=64, n_layers=2, n_heads=4, vocab_size=32, norm_eps=1e-5,
               max_seq_len=32, adapter_len=4, adapter_layer=2, max_feats=4,
               multiple_of=32)
    hidden_dim = int(2 * (4 * cfg['dim']) / 3)
    hidden_dim = cfg['multiple_of'] * (
        (hidden_dim + cfg['multiple_of'] - 1) // cfg['multiple_of'])
    cfg['hidden_dim'] = hidden_dim
    cfg['head_dim'] = cfg['dim'] // cfg['n_heads']
    cos_f, sin_f = precompute_rope_full(cfg['head_dim'], cfg['n_heads'],
                                        cfg['max_seq_len'] * 2)
    cfg['rope_cos'], cfg['rope_sin'] = cos_f, sin_f

    key = jax.random.PRNGKey(0)
    kp, kd1, kd2, kd3 = jax.random.split(key, 4)
    params = init_params(kp, cfg)

    bsz, n_options, seqlen = 2, 1, 16
    vqa_id = jax.random.randint(kd1, (bsz, n_options, seqlen), 1,
                                cfg['vocab_size'])
    vqa_label = jax.random.randint(kd2, (bsz, n_options, seqlen), 1,
                                   cfg['vocab_size'])
    vqa_label = vqa_label.at[:, :, :2].set(0)   # exercise ignore_index=0
    video = jax.random.normal(kd3, (bsz, cfg['max_feats'], 768), jnp.float32)

    data = {'text_id': {'vqa': vqa_id},
            'label': {'vqa': vqa_label},
            'video_start': {'vqa': [2]},
            'video': video}

    loss = transformer_forward(params, cfg, data, inference=False)
    val = jax.block_until_ready(loss['vqa'])
    assert bool(jnp.isfinite(val)), "loss is not finite"
    print("KERNEL_OK")
</pallas_src>

<mosaic_0001>
module attributes {stable_mosaic.version = 11 : i64} {
  func.func @_matmul_kernel(%arg0: i32, %arg1: i32, %arg2: memref<8x768xbf16, #tpu.memory_space<vmem>>, %arg3: memref<768x64xbf16, #tpu.memory_space<vmem>>, %arg4: memref<8x64xf32, #tpu.memory_space<vmem>>) attributes {dimension_semantics = [#tpu.dimension_semantics<parallel>, #tpu.dimension_semantics<parallel>], iteration_bounds = array<i64: 1, 1>, scalar_prefetch = 0 : i64, scratch_operands = 0 : i64, tpu.core_type = #tpu.core_type<tc>, window_params = [{transform_indices = @transform_0, window_bounds = array<i64: 8, 768>}, {transform_indices = @transform_1, window_bounds = array<i64: 768, 64>}, {transform_indices = @transform_2, window_bounds = array<i64: 8, 64>}]} {
    %c0 = arith.constant 0 : index
    %c0_0 = arith.constant 0 : index
    %0 = vector.load %arg2[%c0, %c0_0] : memref<8x768xbf16, #tpu.memory_space<vmem>>, vector<8x768xbf16>
    %c0_1 = arith.constant 0 : index
    %c0_2 = arith.constant 0 : index
    %1 = vector.load %arg3[%c0_1, %c0_2] : memref<768x64xbf16, #tpu.memory_space<vmem>>, vector<768x64xbf16>
    %cst = arith.constant dense<0.000000e+00> : vector<8x64xf32>
    %2 = tpu.matmul %0, %1, %cst {dimension_numbers = #tpu.dot_dimension_numbers<[1], [0], [0], [1], [0, 0, 1, 1], [], []>} : vector<8x768xbf16>, vector<768x64xbf16>, vector<8x64xf32> -> vector<8x64xf32>
    %c0_3 = arith.constant 0 : index
    %c0_4 = arith.constant 0 : index
    %3 = vector.load %arg4[%c0_3, %c0_4] : memref<8x64xf32, #tpu.memory_space<vmem>>, vector<8x64xf32>
    tpu.vector_store %arg4[%c0_3, %c0_4], %2 {strides = array<i32>} : memref<8x64xf32, #tpu.memory_space<vmem>>, vector<8x64xf32>,
    return
  }
  func.func @transform_0(%arg0: i32, %arg1: i32) -> (i32, i32) {
    %c0_i32 = arith.constant 0 : i32
    %c0_i32_0 = arith.constant 0 : i32
    return %arg0, %c0_i32 : i32, i32
  }
  func.func @transform_1(%arg0: i32, %arg1: i32) -> (i32, i32) {
    %c0_i32 = arith.constant 0 : i32
    %c0_i32_0 = arith.constant 0 : i32
    return %c0_i32, %arg1 : i32, i32
  }
  func.func @transform_2(%arg0: i32, %arg1: i32) -> (i32, i32) {
    %c0_i32 = arith.constant 0 : i32
    return %arg0, %arg1 : i32, i32
  }
}

</mosaic_0001>

<bundles_post_ra>
// kernel: tpu_custom_call.1
= control target key start
LH: loop header
LB: loop body
LE: loop exit
PB: predicated region body
PF: predicated region fallthrough
CT: control target
= control target key end

     0   :  { %7 = vsyncpa [#allocation3], 0  ;;  %s899_s0 = inlined_call_operand.hbm [shape: bf16[8,768], index: 0, kind: input, shape index: {}]   ;;  %s900_s1 = inlined_call_operand.hbm [shape: bf16[768,64], index: 1, kind: input, shape index: {}]   ;;  %s901_s2 = inlined_call_operand.hbm [shape: f32[8,64], index: 2, kind: output, shape index: {}]  }
   0x1   :  { %8 = vsyncpa [#allocation6], 0 }
   0x2   :  { %9 = vsyncpa [#allocation4], 0  ;;  %s836_s9 = smov [#allocation2]   ;;  %s837_s11 = smov [#allocation5]  }
   0x3   :  { %s16_s10 = sshll.u32 %s836_s9, 4  ;;  %s25_s12 = sshll.u32 %s837_s11, 4  ;;  %s17_s10 = int_to_ptr.vmem [resolvable:$true] %s16_s10  ;;  %s856_s12 = int_to_ptr.vmem [resolvable:$true] %s25_s12 }
   0x4   :  { %s764_s15 = scalar_lea.hbm %s899_s0, 384 }
   0x5   :  { %p765_p0 = scmp.ne.s32.totalorder %s899_s0, %s764_s15  ;;  %p768_p1 = scmp.lt.u32.totalorder %s764_s15, %s899_s0 }
   0x7   :  { %p770_p2 = pnand %p768_p1, %p765_p0 }
   0x9   :  { %773 = shalt.err (!%p770_p2)
}
   0xa   :  { %s774_s20 = scalar_lea.vmem %s17_s10, 384  ;;  %p779_p4 = scmp.lt.s32.totalorder %s17_s10, %s17_s10 }
   0xb   :  { %p775_p3 = scmp.ne.s32.totalorder %s17_s10, %s774_s20  ;;  %p780_p5 = scmp.lt.s32.totalorder %s774_s20, %s774_s20 }
   0xd   :  { %p781_p6 = por %p780_p5, %p779_p4 }
   0xf   :  { %p782_p7 = pnand %p781_p6, %p775_p3 }
  0x11   :  { %785 = shalt.err (!%p782_p7)
}
  0x12   :  { %19 = dma.hbm_to_vmem [thread:$0]  %s899_s0, 384, %s17_s10, [#allocation3]  }
  0x13   :  { %s786_s25 = scalar_lea.hbm %s900_s1, 6144 }
  0x14   :  { %p787_p8 = scmp.ne.s32.totalorder %s900_s1, %s786_s25  ;;  %p790_p9 = scmp.lt.u32.totalorder %s786_s25, %s900_s1 }
  0x16   :  { %p792_p10 = pnand %p790_p9, %p787_p8 }
  0x18   :  { %795 = shalt.err (!%p792_p10)
}
  0x19   :  { %s796_s30 = scalar_lea.vmem %s856_s12, 6144  ;;  %p801_p12 = scmp.lt.s32.totalorder %s856_s12, %s856_s12 }
  0x1a   :  { %p797_p11 = scmp.ne.s32.totalorder %s856_s12, %s796_s30  ;;  %p802_p13 = scmp.lt.s32.totalorder %s796_s30, %s796_s30 }
  0x1c   :  { %p803_p0 = por %p802_p13, %p801_p12 }
  0x1e   :  { %p804_p1 = pnand %p803_p0, %p797_p11 }
  0x20   :  { %807 = shalt.err (!%p804_p1)
}
  0x21   :  { %s838_s0 = smov 64   ;;  %s839_s3 = smov 4  }
  0x22   :  { %31 = dma.hbm_to_vmem [thread:$0]  %s900_s1, 6144, %s856_s12, [#allocation6], %s838_s0, %s838_s0, %s839_s3  }
  0x23   :  { %830 = dma.done.wait [#allocation3], 384  }
  0x24   :  { %831 = vsyncadd [#allocation3], 4294966912 }
  0x25   :  { %832 = dma.done.wait [#allocation6], 6144  }
  0x26   :  { %833 = vsyncadd [#allocation6], 4294961152  ;;  %v710_v0 = vld [vmem:[#allocation5 + $0x40] sm:$0xff]   ;;  %v714_v4 = vld [vmem:[#allocation5 + $0x48] sm:$0xff]   ;;  %s840_s1 = smov [#allocation7]   ;;  %vm567_vm0 = vcmask 523264  }
  0x27   :  { %v711_v1 = vld [vmem:[#allocation5 + $0xc0] sm:$0xff]   ;;  %639 = vmatprep.subr.bf16.mxu0 %v710_v0  ;;  %v715_v5 = vld [vmem:[#allocation5 + $0xc8] sm:$0xff]   ;;  %v718_v8 = vld [vmem:[#allocation5 + $0x50] sm:$0xff]   ;;  %s575_s6 = sshll.u32 %s840_s1, 4  ;;  %s576_s6 = int_to_ptr.vmem [resolvable:$true] %s575_s6 }
  0x28   :  { %v712_v2 = vld [vmem:[#allocation5] sm:$0xff]   ;;  %661 = vmatprep.subr.bf16.mxu1 %v711_v1  ;;  %v716_v6 = vld [vmem:[#allocation5 + $0x8] sm:$0xff]   ;;  %v719_v9 = vld [vmem:[#allocation5 + $0xd0] sm:$0xff]   ;;  %s808_s7 = scalar_lea.vmem %s576_s6, 128  ;;  %p813_p3 = scmp.lt.s32.totalorder %s576_s6, %s576_s6 }
  0x29   :  { %v713_v3 = vld [vmem:[#allocation5 + $0x80] sm:$0xff]   ;;  %640 = vmatpush3.bf16.msra.mxu0 %v712_v2  ;;  %v717_v7 = vld [vmem:[#allocation5 + $0x88] sm:$0xff]   ;;  %v720_v10 = vld [vmem:[#allocation5 + $0x10] sm:$0xff]   ;;  %p809_p2 = scmp.ne.s32.totalorder %s576_s6, %s808_s7  ;;  %p814_p4 = scmp.lt.s32.totalorder %s808_s7, %s808_s7 }
  0x2a   :  { %662 = vmatpush3.bf16.msra.mxu1 %v713_v3  ;;  %641 = vmatprep.subr.bf16.mxu0 %v714_v4  ;;  %v721_v11 = vld [vmem:[#allocation5 + $0x90] sm:$0xff]   ;;  %v722_v12 = vld [vmem:[#allocation5 + $0x58] sm:$0xff]   ;;  %v726_v16 = vld [vmem:[#allocation5 + $0x60] sm:$0xff]  }
  0x2b   :  { %663 = vmatprep.subr.bf16.mxu1 %v715_v5  ;;  %v723_v13 = vld [vmem:[#allocation5 + $0xd8] sm:$0xff]   ;;  %v727_v17 = vld [vmem:[#allocation5 + $0xe0] sm:$0xff]   ;;  %v730_v20 = vld [vmem:[#allocation5 + $0x68] sm:$0xff]   ;;  %p815_p5 = por %p814_p4, %p813_p3 }
  0x2c   :  { %v724_v14 = vld [vmem:[#allocation5 + $0x18] sm:$0xff]   ;;  %v728_v18 = vld [vmem:[#allocation5 + $0x20] sm:$0xff]   ;;  %v731_v21 = vld [vmem:[#allocation5 + $0xe8] sm:$0xff]  }
  0x2d   :  { %642 = vmatpush3.bf16.msra.mxu0 %v716_v6  ;;  %v725_v15 = vld [vmem:[#allocation5 + $0x98] sm:$0xff]   ;;  %v729_v19 = vld [vmem:[#allocation5 + $0xa0] sm:$0xff]   ;;  %v732_v22 = vld [vmem:[#allocation5 + $0x28] sm:$0xff]   ;;  %p816_p6 = pnand %p815_p5, %p809_p2 }
  0x2e   :  { %664 = vmatpush3.bf16.msra.mxu1 %v717_v7  ;;  %643 = vmatprep.subr.bf16.mxu0 %v718_v8  ;;  %v733_v23 = vld [vmem:[#allocation5 + $0xa8] sm:$0xff]   ;;  %v734_v24 = vld [vmem:[#allocation5 + $0x70] sm:$0xff]   ;;  %v738_v28 = vld [vmem:[#allocation5 + $0x78] sm:$0xff]  }
  0x2f   :  { %665 = vmatprep.subr.bf16.mxu1 %v719_v9  ;;  %v735_v25 = vld [vmem:[#allocation5 + $0xf0] sm:$0xff]   ;;  %v739_v29 = vld [vmem:[#allocation5 + $0xf8] sm:$0xff]   ;;  %v39_v32 = vld [vmem:[#allocation2] sm:$0xff] }
  0x30   :  { %v736_v26 = vld [vmem:[#allocation5 + $0x30] sm:$0xff]   ;;  %v740_v30 = vld [vmem:[#allocation5 + $0x38] sm:$0xff]   ;;  %v585_v34 = vcombine.low %v39_v32, %v39_v32  ;;  %v586_v35 = vcombine.high %v39_v32, %v39_v32  ;;  %v746_v38 = vld [vmem:[#allocation5 + $0x140] sm:$0xff]  }
  0x31   :  { %644 = vmatpush3.bf16.msra.mxu0 %v720_v10  ;;  %v737_v27 = vld [vmem:[#allocation5 + $0xb0] sm:$0xff]   ;;  %v741_v31 = vld [vmem:[#allocation5 + $0xb8] sm:$0xff]   ;;  %v747_v39 = vld [vmem:[#allocation5 + $0x100] sm:$0xff]  }
  0x32   :  { %666 = vmatpush3.bf16.msra.mxu1 %v721_v11  ;;  %645 = vmatprep.subr.bf16.mxu0 %v722_v12  ;;  %v40_v33 = vld [vmem:[#allocation2 + $0x8] sm:$0xff]  ;;  %v748_v40 = vld [vmem:[#allocation5 + $0x148] sm:$0xff]   ;;  %v752_v44 = vld [vmem:[#allocation5 + $0x158] sm:$0xff]  }
  0x33   :  { %667 = vmatprep.subr.bf16.mxu1 %v723_v13  ;;  %v587_v36 = vcombine.low %v40_v33, %v40_v33  ;;  %v588_v37 = vcombine.high %v40_v33, %v40_v33  ;;  %479 = vmatprep.mubr.bf16.mxu0 %v586_v35  ;;  %v749_v41 = vld [vmem:[#allocation5 + $0x108] sm:$0xff]   ;;  %v750_v42 = vld [vmem:[#allocation5 + $0x150] sm:$0xff]   ;;  %v753_v45 = vld [vmem:[#allocation5 + $0x118] sm:$0xff]  }
  0x34   :  { %v751_v43 = vld [vmem:[#allocation5 + $0x110] sm:$0xff]   ;;  %v754_v46 = vld [vmem:[#allocation5 + $0x160] sm:$0xff]   ;;  %v41_v47 = vld [vmem:[#allocation2 + $0x10] sm:$0xff] }
  0x35   :  { %646 = vmatpush3.bf16.msra.mxu0 %v724_v14  ;;  %519 = vmatprep.mubr.bf16.mxu1 %v588_v37  ;;  %v590_v48 = vcombine.high %v41_v47, %v41_v47  ;;  %v755_v49 = vld [vmem:[#allocation5 + $0x120] sm:$0xff]   ;;  %v756_v50 = vld [vmem:[#allocation5 + $0x168] sm:$0xff]   ;;  %v758_v52 = vld [vmem:[#allocation5 + $0x170] sm:$0xff]   ;;  %v589_v56 = vcombine.low %v41_v47, %v41_v47 }
  0x36   :  { %668 = vmatpush3.bf16.msra.mxu1 %v725_v15  ;;  %647 = vmatprep.subr.bf16.mxu0 %v726_v16  ;;  %v757_v51 = vld [vmem:[#allocation5 + $0x128] sm:$0xff]   ;;  %v759_v53 = vld [vmem:[#allocation5 + $0x130] sm:$0xff]   ;;  %v760_v54 = vld [vmem:[#allocation5 + $0x178] sm:$0xff]  }
  0x37   :  { %669 = vmatprep.subr.bf16.mxu1 %v727_v17  ;;  %v761_v55 = vld [vmem:[#allocation5 + $0x138] sm:$0xff]  }
  0x39   :  { %648 = vmatpush3.bf16.msra.mxu0 %v728_v18 }
  0x3a   :  { %670 = vmatpush3.bf16.msra.mxu1 %v729_v19  ;;  %649 = vmatprep.subr.bf16.mxu0 %v730_v20 }
  0x3b   :  { %671 = vmatprep.subr.bf16.mxu1 %v731_v21 }
  0x3d   :  { %650 = vmatpush3.bf16.msra.mxu0 %v732_v22 }
  0x3e   :  { %672 = vmatpush3.bf16.msra.mxu1 %v733_v23  ;;  %651 = vmatprep.subr.bf16.mxu0 %v734_v24 }
  0x3f   :  { %673 = vmatprep.subr.bf16.mxu1 %v735_v25 }
  0x41   :  { %652 = vmatpush3.bf16.msra.mxu0 %v736_v26 }
  0x42   :  { %674 = vmatpush3.bf16.msra.mxu1 %v737_v27  ;;  %653 = vmatprep.subr.bf16.mxu0 %v738_v28 }
  0x43   :  { %675 = vmatprep.subr.bf16.mxu1 %v739_v29 }
  0x45   :  { %654 = vmatpush3.bf16.msra.mxu0 %v740_v30 }
  0x46   :  { %676 = vmatpush3.bf16.msra.mxu1 %v741_v31  ;;  %683 = vmatprep.subr.bf16.mxu0 %v746_v38 }
  0x48   :  { %480 = vmatmul.mubr.bf16.vlgmr.msra.gmra.mrb[0].mxu0 %v585_v34 }
  0x49   :  { %520 = vmatmul.mubr.bf16.vlgmr.msra.gmra.mrb[0].mxu1 %v587_v36  ;;  %684 = vmatpush3.bf16.msra.mxu0 %v747_v39 }
  0x4a   :  { %685 = vmatprep.subr.bf16.mxu0 %v748_v40  ;;  %559 = vmatprep.mubr.bf16.mxu0 %v590_v48 }
  0x4d   :  { %686 = vmatpush3.bf16.msra.mxu0 %v749_v41 }
  0x4e   :  { %687 = vmatprep.subr.bf16.mxu0 %v750_v42 }
  0x51   :  { %688 = vmatpush3.bf16.msra.mxu0 %v751_v43 }
  0x52   :  { %689 = vmatprep.subr.bf16.mxu0 %v752_v44 }
  0x55   :  { %690 = vmatpush3.bf16.msra.mxu0 %v753_v45 }
  0x56   :  { %691 = vmatprep.subr.bf16.mxu0 %v754_v46 }
  0x59   :  { %692 = vmatpush3.bf16.msra.mxu0 %v755_v49 }
  0x5a   :  { %693 = vmatprep.subr.bf16.mxu0 %v756_v50 }
  0x5d   :  { %694 = vmatpush3.bf16.msra.mxu0 %v757_v51 }
  0x5e   :  { %695 = vmatprep.subr.bf16.mxu0 %v758_v52 }
  0x61   :  { %696 = vmatpush3.bf16.msra.mxu0 %v759_v53 }
  0x62   :  { %697 = vmatprep.subr.bf16.mxu0 %v760_v54 }
  0x65   :  { %698 = vmatpush3.bf16.msra.mxu0 %v761_v55 }
  0x68   :  { %560 = vmatmul.mubr.bf16.vlgmr.msra.gmra.mrb[4].mxu0 %v589_v56 }
 0x11b   :  { %v655_v57 = vpop.f32.mrb[0].mxu0 }
 0x11c   :  { %v677_v58 = vpop.f32.mrb[0].mxu1  ;;  %v656_v59 = vpop.f32.mrb[1].mxu0 }
 0x11d   :  { %v678_v60 = vpop.f32.mrb[1].mxu1  ;;  %v657_v61 = vadd.f32 %v656_v59, %v655_v57  ;;  %v658_v63 = vpop.f32.mrb[2].mxu0 }
 0x11e   :  { %v679_v62 = vadd.f32 %v678_v60, %v677_v58  ;;  %v680_v0 = vpop.f32.mrb[2].mxu1  ;;  %v659_v1 = vpop.f32.mrb[3].mxu0 }
 0x11f   :  { %v681_v2 = vpop.f32.mrb[3].mxu1 }
 0x120   :  { %v522_v3 = vadd.f32 %v679_v62, %v657_v61 }
 0x13b   :  { %v699_v4 = vpop.f32.mrb[4].mxu0 }
 0x13c   :  { %v700_v5 = vpop.f32.mrb[5].mxu0 }
 0x13d   :  { %v701_v6 = vadd.f32 %v700_v5, %v699_v4  ;;  %v702_v7 = vpop.f32.mrb[6].mxu0 }
 0x13e   :  { %v703_v8 = vpop.f32.mrb[7].mxu0 }
 0x13f   :  { %v562_v9 = vadd.f32 %v701_v6, %v522_v3 }
 0x141   :  { %568 = vst.msk [vmem:[#allocation7] sm:$0xff] %vm567_vm0, %v562_v9 }
 0x142   :  { %819 = shalt.err (!%p816_p6)
}
 0x143   :  { %s820_s10 = scalar_lea.hbm %s901_s2, 128 }
 0x144   :  { %p821_p7 = scmp.ne.s32.totalorder %s901_s2, %s820_s10  ;;  %p824_p8 = scmp.lt.u32.totalorder %s820_s10, %s901_s2 }
 0x146   :  { %p826_p9 = pnand %p824_p8, %p821_p7 }
 0x148   :  { %829 = shalt.err (!%p826_p9)
}
 0x149   :  { %578 = dma.vmem_to_hbm [thread:$0]  %s576_s6, 128, %s901_s2, [#allocation4]  }
 0x14a   :  { %834 = dma.done.wait [#allocation4], 128  }
 0x14b   :  { %835 = vsyncadd [#allocation4], 4294967168 }
 0x14c   :  { %582 = vsyncpa [#allocation3], 1 }
 0x14d   :  { %583 = vsyncpa [#allocation6], 1 }
 0x14e   :  { %584 = vsyncpa [#allocation4], 1 }

</bundles_post_ra>
